<compile_context>
chip_gen: v7x
topology: tpu7x:2x2x1
jax: 0.10.0
libtpu: 0.0.40
codegen_flags: <defaults>
</compile_context>

<pallas_src>
import jax
import jax.numpy as jnp
from jax.experimental import pallas as pl
from jax.experimental.pallas import tpu as pltpu

ROW = 8  # sublane granularity for f32 tiles


def _round_up(n: int, m: int) -> int:
    return ((n + m - 1) // m) * m


def _mlp_kernel(x_ref, w1_ref, b1_ref, w2_ref, b2_ref, w3_ref, b3_ref, out_ref):
    # layer1 + ReLU
    h1 = jnp.dot(x_ref[...], w1_ref[...], preferred_element_type=jnp.float32)
    h1 = jnp.maximum(h1 + b1_ref[...], 0.0)
    # layer2 + ReLU
    h2 = jnp.dot(h1, w2_ref[...], preferred_element_type=jnp.float32)
    h2 = jnp.maximum(h2 + b2_ref[...], 0.0)
    # layer3 (no activation)
    out = jnp.dot(h2, w3_ref[...], preferred_element_type=jnp.float32)
    out_ref[...] = (out + b3_ref[...]).astype(out_ref.dtype)


def action_value_network(x, params, *, tile_b=4096):
    """Forward pass of ActionValueNetwork as one fused Pallas TPU kernel.

    x:      (B, state_dim) float32
    params: dict with w1 (S,H), b1 (1,H), w2 (H,H), b2 (1,H), w3 (H,A), b3 (1,A)
            (float32, (in, out) layout)
    returns (B, num_actions) float32
    """
    B, S = x.shape
    H = params["w1"].shape[1]
    A = params["w3"].shape[1]

    w1, b1 = params["w1"], params["b1"]
    w2, b2 = params["w2"], params["b2"]
    w3, b3 = params["w3"], params["b3"]

    # Batch tile: multiple of 8 (sublane), never larger than the rounded-up batch,
    # and capped so batches of >= 16 rows get at least 2 grid steps (v7x megacore).
    tb = min(tile_b, _round_up(B, ROW))
    if B >= 2 * ROW:
        tb = min(tb, _round_up(pl.cdiv(B, 2), ROW))
    tb = max(ROW, _round_up(tb, ROW))
    grid = (pl.cdiv(B, tb),)

    const2d = lambda i: (0, 0)  # weights/biases: same block every step -> VMEM-resident

    flops = 2 * B * (S * H + H * H + H * A)
    bytes_accessed = 4 * (B * S + B * A + S * H + H + H * H + H + H * A + A)

    out = pl.pallas_call(
        _mlp_kernel,
        out_shape=jax.ShapeDtypeStruct((B, A), jnp.float32),
        grid=grid,
        in_specs=[
            pl.BlockSpec((tb, S), lambda i: (i, 0)),   # x: streamed/pipelined per tile
            pl.BlockSpec((S, H), const2d),             # w1
            pl.BlockSpec((1, H), const2d),             # b1
            pl.BlockSpec((H, H), const2d),             # w2
            pl.BlockSpec((1, H), const2d),             # b2
            pl.BlockSpec((H, A), const2d),             # w3 (true width, no lane padding)
            pl.BlockSpec((1, A), const2d),             # b3
        ],
        out_specs=pl.BlockSpec((tb, A), lambda i: (i, 0)),
        compiler_params=pltpu.CompilerParams(
            dimension_semantics=("parallel",),         # megacore sharding on v7x
        ),
        cost_estimate=pl.CostEstimate(
            flops=flops, bytes_accessed=bytes_accessed, transcendentals=0),
    )(x, w1, b1, w2, b2, w3, b3)

    return out


def init_params(key, state_dim, num_hidden_units, num_actions):
    """Deterministic init mimicking PyTorch nn.Linear default (uniform +/- 1/sqrt(fan_in)).
    Weights are stored transposed relative to PyTorch: shape (in, out)."""
    ks = jax.random.split(key, 6)

    def uniform(k, shape, fan_in):
        bound = 1.0 / jnp.sqrt(float(fan_in))
        return jax.random.uniform(k, shape, jnp.float32, -bound, bound)

    return {
        "w1": uniform(ks[0], (state_dim, num_hidden_units), state_dim),
        "b1": uniform(ks[1], (1, num_hidden_units), state_dim),
        "w2": uniform(ks[2], (num_hidden_units, num_hidden_units), num_hidden_units),
        "b2": uniform(ks[3], (1, num_hidden_units), num_hidden_units),
        "w3": uniform(ks[4], (num_hidden_units, num_actions), num_hidden_units),
        "b3": uniform(ks[5], (1, num_actions), num_hidden_units),
    }


def _reference_f32(x, p):
    h1 = jnp.maximum(x @ p["w1"] + p["b1"], 0.0)
    h2 = jnp.maximum(h1 @ p["w2"] + p["b2"], 0.0)
    return h2 @ p["w3"] + p["b3"]


if __name__ == "__main__":
    # LunarLander-like config: state_dim=8, hidden=32, actions=4 (small demo shapes).
    # TODO(synk): hidden=128/256 (lane-width multiple) is essentially free at runtime
    # per the roofline analysis, but we keep hidden=32 to match the reference config.
    state_dim, num_hidden_units, num_actions = 8, 32, 4

    key = jax.random.PRNGKey(0)
    k_params, k_x1, k_x2 = jax.random.split(key, 3)
    params = init_params(k_params, state_dim, num_hidden_units, num_actions)

    # Case 1: tiny batch (single grid step).
    x1 = jax.random.normal(k_x1, (8, state_dim), jnp.float32)
    out1 = jax.block_until_ready(action_value_network(x1, params))
    ref1 = _reference_f32(x1, params)
    assert out1.shape == (8, num_actions)
    assert jnp.allclose(out1, ref1, atol=1e-2, rtol=1e-2), "mismatch (case 1)"

    # Case 2: non-multiple-of-8 batch with a small tile -> multi-step grid with a
    # partial last block (out-of-range rows masked on write).
    x2 = jax.random.normal(k_x2, (45, state_dim), jnp.float32)
    out2 = jax.block_until_ready(action_value_network(x2, params, tile_b=16))
    ref2 = _reference_f32(x2, params)
    assert out2.shape == (45, num_actions)
    assert jnp.allclose(out2, ref2, atol=1e-2, rtol=1e-2), "mismatch (case 2)"

    print("KERNEL_OK")
</pallas_src>

<mosaic_0001>
module attributes {stable_mosaic.version = 11 : i64} {
  func.func @_mlp_kernel(%arg0: i32, %arg1: memref<8x8xf32, #tpu.memory_space<vmem>>, %arg2: memref<8x32xf32, #tpu.memory_space<vmem>>, %arg3: memref<1x32xf32, #tpu.memory_space<vmem>>, %arg4: memref<32x32xf32, #tpu.memory_space<vmem>>, %arg5: memref<1x32xf32, #tpu.memory_space<vmem>>, %arg6: memref<32x4xf32, #tpu.memory_space<vmem>>, %arg7: memref<1x4xf32, #tpu.memory_space<vmem>>, %arg8: memref<8x4xf32, #tpu.memory_space<vmem>>) attributes {dimension_semantics = [#tpu.dimension_semantics<parallel>], iteration_bounds = array<i64: 1>, scalar_prefetch = 0 : i64, scratch_operands = 0 : i64, tpu.core_type = #tpu.core_type<tc>, window_params = [{transform_indices = @transform_0, window_bounds = array<i64: 8, 8>}, {pipeline_mode = #tpu.pipeline_mode<synchronous>, transform_indices = @transform_1, window_bounds = array<i64: 8, 32>}, {pipeline_mode = #tpu.pipeline_mode<synchronous>, transform_indices = @transform_2, window_bounds = array<i64: 1, 32>}, {pipeline_mode = #tpu.pipeline_mode<synchronous>, transform_indices = @transform_3, window_bounds = array<i64: 32, 32>}, {pipeline_mode = #tpu.pipeline_mode<synchronous>, transform_indices = @transform_4, window_bounds = array<i64: 1, 32>}, {pipeline_mode = #tpu.pipeline_mode<synchronous>, transform_indices = @transform_5, window_bounds = array<i64: 32, 4>}, {pipeline_mode = #tpu.pipeline_mode<synchronous>, transform_indices = @transform_6, window_bounds = array<i64: 1, 4>}, {transform_indices = @transform_7, window_bounds = array<i64: 8, 4>}]} {
    %c0 = arith.constant 0 : index
    %c0_0 = arith.constant 0 : index
    %0 = vector.load %arg1[%c0, %c0_0] : memref<8x8xf32, #tpu.memory_space<vmem>>, vector<8x8xf32>
    %c0_1 = arith.constant 0 : index
    %c0_2 = arith.constant 0 : index
    %1 = vector.load %arg2[%c0_1, %c0_2] : memref<8x32xf32, #tpu.memory_space<vmem>>, vector<8x32xf32>
    %cst = arith.constant dense<0.000000e+00> : vector<8x32xf32>
    %2 = tpu.matmul %0, %1, %cst {dimension_numbers = #tpu.dot_dimension_numbers<[1], [0], [0], [1], [0, 0, 1, 1], [], []>} : vector<8x8xf32>, vector<8x32xf32>, vector<8x32xf32> -> vector<8x32xf32>
    %c0_3 = arith.constant 0 : index
    %c0_4 = arith.constant 0 : index
    %3 = vector.load %arg3[%c0_3, %c0_4] : memref<1x32xf32, #tpu.memory_space<vmem>>, vector<1x32xf32>
    %4 = vector.broadcast %3 : vector<1x32xf32> to vector<8x32xf32>
    %5 = arith.addf %2, %4 : vector<8x32xf32>
    %cst_5 = arith.constant 0.000000e+00 : f32
    %6 = vector.broadcast %cst_5 : f32 to vector<8x32xf32>
    %7 = arith.maximumf %5, %6 : vector<8x32xf32>
    %c0_6 = arith.constant 0 : index
    %c0_7 = arith.constant 0 : index
    %8 = vector.load %arg4[%c0_6, %c0_7] : memref<32x32xf32, #tpu.memory_space<vmem>>, vector<32x32xf32>
    %cst_8 = arith.constant dense<0.000000e+00> : vector<8x32xf32>
    %9 = tpu.matmul %7, %8, %cst_8 {dimension_numbers = #tpu.dot_dimension_numbers<[1], [0], [0], [1], [0, 0, 1, 1], [], []>} : vector<8x32xf32>, vector<32x32xf32>, vector<8x32xf32> -> vector<8x32xf32>
    %c0_9 = arith.constant 0 : index
    %c0_10 = arith.constant 0 : index
    %10 = vector.load %arg5[%c0_9, %c0_10] : memref<1x32xf32, #tpu.memory_space<vmem>>, vector<1x32xf32>
    %11 = vector.broadcast %10 : vector<1x32xf32> to vector<8x32xf32>
    %12 = arith.addf %9, %11 : vector<8x32xf32>
    %cst_11 = arith.constant 0.000000e+00 : f32
    %13 = vector.broadcast %cst_11 : f32 to vector<8x32xf32>
    %14 = arith.maximumf %12, %13 : vector<8x32xf32>
    %c0_12 = arith.constant 0 : index
    %c0_13 = arith.constant 0 : index
    %15 = vector.load %arg6[%c0_12, %c0_13] : memref<32x4xf32, #tpu.memory_space<vmem>>, vector<32x4xf32>
    %cst_14 = arith.constant dense<0.000000e+00> : vector<8x4xf32>
    %16 = tpu.matmul %14, %15, %cst_14 {dimension_numbers = #tpu.dot_dimension_numbers<[1], [0], [0], [1], [0, 0, 1, 1], [], []>} : vector<8x32xf32>, vector<32x4xf32>, vector<8x4xf32> -> vector<8x4xf32>
    %c0_15 = arith.constant 0 : index
    %c0_16 = arith.constant 0 : index
    %17 = vector.load %arg7[%c0_15, %c0_16] : memref<1x4xf32, #tpu.memory_space<vmem>>, vector<1x4xf32>
    %18 = vector.broadcast %17 : vector<1x4xf32> to vector<8x4xf32>
    %19 = arith.addf %16, %18 : vector<8x4xf32>
    %c0_17 = arith.constant 0 : index
    %c0_18 = arith.constant 0 : index
    %20 = vector.load %arg8[%c0_17, %c0_18] : memref<8x4xf32, #tpu.memory_space<vmem>>, vector<8x4xf32>
    tpu.vector_store %arg8[%c0_17, %c0_18], %19 {strides = array<i32>} : memref<8x4xf32, #tpu.memory_space<vmem>>, vector<8x4xf32>,
    return
  }
  func.func @transform_0(%arg0: i32) -> (i32, i32) {
    %c0_i32 = arith.constant 0 : i32
    %c0_i32_0 = arith.constant 0 : i32
    return %arg0, %c0_i32 : i32, i32
  }
  func.func @transform_1(%arg0: i32) -> (i32, i32) {
    %c0_i32 = arith.constant 0 : i32
    %c0_i32_0 = arith.constant 0 : i32
    %c0_i32_1 = arith.constant 0 : i32
    return %c0_i32, %c0_i32_0 : i32, i32
  }
  func.func @transform_2(%arg0: i32) -> (i32, i32) {
    %c0_i32 = arith.constant 0 : i32
    %c0_i32_0 = arith.constant 0 : i32
    %c0_i32_1 = arith.constant 0 : i32
    return %c0_i32, %c0_i32_0 : i32, i32
  }
  func.func @transform_3(%arg0: i32) -> (i32, i32) {
    %c0_i32 = arith.constant 0 : i32
    %c0_i32_0 = arith.constant 0 : i32
    %c0_i32_1 = arith.constant 0 : i32
    return %c0_i32, %c0_i32_0 : i32, i32
  }
  func.func @transform_4(%arg0: i32) -> (i32, i32) {
    %c0_i32 = arith.constant 0 : i32
    %c0_i32_0 = arith.constant 0 : i32
    %c0_i32_1 = arith.constant 0 : i32
    return %c0_i32, %c0_i32_0 : i32, i32
  }
  func.func @transform_5(%arg0: i32) -> (i32, i32) {
    %c0_i32 = arith.constant 0 : i32
    %c0_i32_0 = arith.constant 0 : i32
    %c0_i32_1 = arith.constant 0 : i32
    return %c0_i32, %c0_i32_0 : i32, i32
  }
  func.func @transform_6(%arg0: i32) -> (i32, i32) {
    %c0_i32 = arith.constant 0 : i32
    %c0_i32_0 = arith.constant 0 : i32
    %c0_i32_1 = arith.constant 0 : i32
    return %c0_i32, %c0_i32_0 : i32, i32
  }
  func.func @transform_7(%arg0: i32) -> (i32, i32) {
    %c0_i32 = arith.constant 0 : i32
    %c0_i32_0 = arith.constant 0 : i32
    return %arg0, %c0_i32 : i32, i32
  }
}

</mosaic_0001>

<bundles_post_ra>
// kernel: tpu_custom_call.1
= control target key start
LH: loop header
LB: loop body
LE: loop exit
PB: predicated region body
PF: predicated region fallthrough
CT: control target
= control target key end

     0   :  { %12 = vsyncpa [#allocation3], 0  ;;  %s384_s24 = smov [#allocation2]   ;;  %s479_s0 = inlined_call_operand.vmem [shape: f32[8,8], index: 0, kind: input, shape index: {}]   ;;  %s480_s1 = inlined_call_operand.hbm [shape: f32[8,32], index: 1, kind: input, shape index: {}]   ;;  %s481_s2 = inlined_call_operand.vmem [shape: f32[1,32], index: 2, kind: input, shape index: {}]   ;;  %s482_s3 = inlined_call_operand.vmem [shape: f32[32,32], index: 3, kind: input, shape index: {}]   ;;  %s483_s4 = inlined_call_operand.vmem [shape: f32[1,32], index: 4, kind: input, shape index: {}]   ;;  %s484_s5 = inlined_call_operand.vmem [shape: f32[32,4], index: 5, kind: input, shape index: {}]   ;;  %s485_s6 = inlined_call_operand.vmem [shape: f32[1,4], index: 6, kind: input, shape index: {}]   ;;  %s486_s7 = inlined_call_operand.vmem [shape: f32[8,4], index: 7, kind: output, shape index: {}]  }
   0x1   :  { %s21_s25 = sshll.u32 %s384_s24, 4  ;;  %s360_s28 = scalar_lea.hbm %s480_s1, 128  ;;  %s22_s25 = int_to_ptr.vmem [resolvable:$true] %s21_s25 }
   0x2   :  { %p361_p0 = scmp.ne.s32.totalorder %s480_s1, %s360_s28  ;;  %p364_p1 = scmp.lt.u32.totalorder %s360_s28, %s480_s1 }
   0x4   :  { %p366_p2 = pnand %p364_p1, %p361_p0 }
   0x6   :  { %369 = shalt.err (!%p366_p2)
}
   0x7   :  { %s370_s10 = scalar_lea.vmem %s22_s25, 128  ;;  %p375_p4 = scmp.lt.s32.totalorder %s22_s25, %s22_s25 }
   0x8   :  { %p371_p3 = scmp.ne.s32.totalorder %s22_s25, %s370_s10  ;;  %p376_p5 = scmp.lt.s32.totalorder %s370_s10, %s370_s10 }
   0xa   :  { %p377_p6 = por %p376_p5, %p375_p4 }
   0xc   :  { %p378_p7 = pnand %p377_p6, %p371_p3 }
   0xe   :  { %381 = shalt.err (!%p378_p7)
}
   0xf   :  { %24 = dma.hbm_to_vmem [thread:$0]  %s480_s1, 128, %s22_s25, [#allocation3]  }
  0x10   :  { %382 = dma.done.wait [#allocation3], 128  }
  0x11   :  { %383 = vsyncadd [#allocation3], 4294967168  ;;  %v385_v0 = vmov 0.0   ;;  %vm386_vm0 = vmmov 0   ;;  %v387_v1 = vmov 0.0|0.0   ;;  %vm47_vm1 = vcmask 64512  }
  0x12   :  { %317 = vmatprep.subr.mxu0 %v385_v0  ;;  %319 = vmatprep.mubr.msk.f32.mxu0 %vm386_vm0, %v385_v0  ;;  %v39_v2 = vld [vmem:[#allocation2] sm:$0xff]  ;;  %v123_v5 = vld [vmem:[%s482_s3 + $0x8] sm:$0xff]  ;;  %v124_v7 = vld [vmem:[%s482_s3 + $0x10] sm:$0xff]  ;;  %vm133_vm2 = vcmask 261120   ;;  %vm292_vm3 = vcmask 31744  }
  0x13   :  { %344 = vmatprep.subr.bf16.mxu1 %v387_v1  ;;  %330 = vmatprep.mubr.msk.f32.mxu1 %vm386_vm0, %v385_v0  ;;  %v38_v3 = vld [vmem:[%s479_s0] sm:$0xff]  ;;  %v125_v8 = vld [vmem:[%s482_s3 + $0x18] sm:$0xff]  ;;  %v209_v11 = vld [vmem:[%s484_s5 + $0x8] sm:$0xff] }
  0x14   :  { %v122_v4 = vld [vmem:[%s482_s3] sm:$0xff]  ;;  %318 = vmatpush3.msra.mxu0 %v39_v2  ;;  %v348_v9 = vpack.c.bf16 %v125_v8, %v124_v7  ;;  %v210_v18 = vld [vmem:[%s484_s5 + $0x10] sm:$0xff]  ;;  %v211_v19 = vld [vmem:[%s484_s5 + $0x18] sm:$0xff] }
  0x15   :  { %320 = vmatmul.mubr.msk.f32.vlgmr.msra.gmra.mrb[0].mxu0 %vm47_vm1, %v38_v3  ;;  %v345_v6 = vpack.c.bf16 %v123_v5, %v122_v4  ;;  %350 = vmatprep.subr.bf16.mxu0 %v387_v1  ;;  %v208_v10 = vld [vmem:[%s484_s5] sm:$0xff]  ;;  %v354_v20 = vpack.c.bf16 %v211_v19, %v210_v18 }
  0x16   :  { %341 = vmatprep.mubr.msk.f32.mxu0 %vm386_vm0, %v385_v0  ;;  %v351_v12 = vpack.c.bf16 %v209_v11, %v208_v10  ;;  %v299_v13 = vld [vmem:[%s481_s2] ss:$0 sm:$0xff] }
  0x17   :  { %346 = vmatpush3.bf16.msra.mxu1 %v345_v6  ;;  %v301_v21 = vld [vmem:[%s483_s4] ss:$0 sm:$0xff] }
  0x18   :  { %347 = vmatprep.subr.bf16.mxu1 %v387_v1  ;;  %352 = vmatpush3.bf16.msra.mxu0 %v351_v12  ;;  %v303_v26 = vld [vmem:[%s485_s6] ss:$0 sm:$0xff] }
  0x19   :  { %353 = vmatprep.subr.bf16.mxu0 %v387_v1 }
  0x1b   :  { %349 = vmatpush3.bf16.msra.mxu1 %v348_v9 }
  0x1c   :  { %355 = vmatpush3.bf16.msra.mxu0 %v354_v20 }
  0xe8   :  { %v117_v14 = vpop.f32.mrb[0].mxu0 }
  0xe9   :  { %v118_v15 = vadd.f32 %v299_v13, %v117_v14  ;;  %v321_v16 = vpop.f32.mrb[1].mxu0 }
  0xeb   :  { %v121_v17 = vmax.f32 %v118_v15, 0.0 }
  0xed   :  { %331 = vmatmul.mubr.msk.f32.vlgmr.msra.gmra.mrb[0].mxu1 %vm133_vm2, %v121_v17 }
 0x1c0   :  { %v203_v22 = vpop.f32.mrb[0].mxu1 }
 0x1c1   :  { %v204_v23 = vadd.f32 %v301_v21, %v203_v22  ;;  %v332_v24 = vpop.f32.mrb[1].mxu1 }
 0x1c3   :  { %v207_v25 = vmax.f32 %v204_v23, 0.0 }
 0x1c5   :  { %342 = vmatmul.mubr.msk.f32.vlgmr.msra.gmra.mrb[2].mxu0 %vm133_vm2, %v207_v25 }
 0x298   :  { %v288_v27 = vpop.f32.mrb[2].mxu0 }
 0x299   :  { %v289_v28 = vadd.f32 %v303_v26, %v288_v27  ;;  %v343_v29 = vpop.f32.mrb[3].mxu0 }
 0x29b   :  { %293 = vst.msk [vmem:[%s486_s7] sm:$0xff] %vm292_vm3, %v289_v28 }
 0x29c   :  { %298 = vsyncpa [#allocation3], 1 }

</bundles_post_ra>
